<compile_context>
chip_gen: v7x
topology: tpu7x:2x2x1
jax: 0.10.0
libtpu: 0.0.40
codegen_flags: <defaults>
</compile_context>

<pallas_src>
import math

import jax
import jax.numpy as jnp
from jax.experimental import pallas as pl
from jax.experimental.pallas import tpu as pltpu


def _round_up(n, m):
    return ((n + m - 1) // m) * m


def _prefer_256_alignment():
    """True on MXU-256 generations (v6e/v7x); False on v5e/older or unknown."""
    try:
        kind = jax.devices()[0].device_kind.lower()
        return not any(t in kind for t in ("v2", "v3", "v4", "v5"))
    except Exception:
        return False


def _lane_align(dim, big_mxu):
    # Pad to 128 (always legal, tightest) unless the real dim is already big
    # enough that 256-alignment costs nothing meaningful on a 256-wide MXU.
    if big_mxu and dim >= 256:
        return _round_up(dim, 256)
    return _round_up(dim, 128)


def _discriminator_kernel(x_ref, w1_ref, b1_ref, w2_ref, b2_ref, out_ref):
    # x: (TB, IMG_p) bf16, w1: (IMG_p, H_p) bf16, b1: (1, H_p) f32,
    # w2: (H_p, O_p) bf16, b2: (1, O_p) f32, out: (TB, O_p) f32.
    h = jnp.dot(x_ref[...], w1_ref[...], preferred_element_type=jnp.float32)
    h = jnp.maximum(h + b1_ref[...], 0.0)                     # f32 epilogue
    logits = jnp.dot(h.astype(jnp.bfloat16), w2_ref[...],
                     preferred_element_type=jnp.float32)
    logits = logits + b2_ref[...]
    out_ref[...] = jax.nn.sigmoid(logits).astype(out_ref.dtype)


def make_discriminator(w1, b1, w2, b2, *, batch_tile=256):
    """Pads/casts the parameters once and returns a jitted forward(x)->(B, O)."""
    IMG, H = w1.shape
    O = w2.shape[1]

    big_mxu = _prefer_256_alignment()
    IMG_p = _lane_align(IMG, big_mxu)
    H_p = _lane_align(H, big_mxu)
    O_p = _round_up(O, 128)          # lane-dense output store
    SUB = 16                         # bf16 sublane packing for the batch axis

    # One-time parameter padding (outside the per-call path).
    w1p = jnp.zeros((IMG_p, H_p), jnp.bfloat16).at[:IMG, :H].set(
        w1.astype(jnp.bfloat16))
    b1p = jnp.zeros((1, H_p), jnp.float32).at[0, :H].set(b1.astype(jnp.float32))
    w2p = jnp.zeros((H_p, O_p), jnp.bfloat16).at[:H, :O].set(
        w2.astype(jnp.bfloat16))
    b2p = jnp.zeros((1, O_p), jnp.float32).at[0, :O].set(b2.astype(jnp.float32))

    def _forward(x, w1p, b1p, w2p, b2p):
        B = x.shape[0]
        assert x.shape[1] == IMG, "image_size mismatch"

        # Adaptive batch tiling: >= 2 grid steps when the batch allows (feeds
        # both v7x TensorCores via the "parallel" axis) and bounded padding.
        B_p0 = _round_up(B, SUB)
        n_steps = math.ceil(B_p0 / batch_tile)
        if B_p0 >= 2 * SUB:
            n_steps = max(n_steps, 2)
        TB = _round_up(math.ceil(B_p0 / n_steps), SUB)
        B_p = _round_up(B_p0, TB)
        grid = (B_p // TB,)

        # Only x is padded per call; this fuses under jit.
        xp = jnp.zeros((B_p, IMG_p), jnp.bfloat16).at[:B, :IMG].set(
            x.astype(jnp.bfloat16))

        cost = pl.CostEstimate(
            flops=2 * B_p * (IMG_p * H_p + H_p * O_p),
            transcendentals=B_p * O_p,
            bytes_accessed=(xp.size * 2 + w1p.size * 2 + w2p.size * 2
                            + b1p.size * 4 + b2p.size * 4 + B_p * O_p * 4),
        )

        # VMEM budget: double-buffered x/out tiles, weights/biases counted at
        # their default double-buffered footprint, plus the f32 intermediate.
        tile_vmem = (2 * TB * IMG_p * 2
                     + 2 * TB * O_p * 4
                     + 2 * (w1p.size * 2 + w2p.size * 2
                            + b1p.size * 4 + b2p.size * 4)
                     + TB * H_p * 4)
        vmem_limit = int(min(max(2 * tile_vmem, 8 << 20), 48 << 20))

        out_p = pl.pallas_call(
            _discriminator_kernel,
            out_shape=jax.ShapeDtypeStruct((B_p, O_p), jnp.float32),
            grid_spec=pltpu.PrefetchScalarGridSpec(
                num_scalar_prefetch=0,
                grid=grid,
                in_specs=[
                    pl.BlockSpec((TB, IMG_p), lambda i: (i, 0)),    # x tile
                    pl.BlockSpec((IMG_p, H_p), lambda i: (0, 0)),   # W1 resident
                    pl.BlockSpec((1, H_p), lambda i: (0, 0)),       # b1 resident
                    pl.BlockSpec((H_p, O_p), lambda i: (0, 0)),     # W2 resident
                    pl.BlockSpec((1, O_p), lambda i: (0, 0)),       # b2 resident
                ],
                out_specs=pl.BlockSpec((TB, O_p), lambda i: (i, 0)),
            ),
            compiler_params=pltpu.CompilerParams(
                dimension_semantics=("parallel",),
                vmem_limit_bytes=vmem_limit,
            ),
            cost_estimate=cost,
        )(xp, w1p, b1p, w2p, b2p)

        return out_p[:B, :O]

    fwd = jax.jit(_forward)
    return lambda x: fwd(x, w1p, b1p, w2p, b2p)


def _reference_forward(x, w1, b1, w2, b2):
    h = jnp.maximum(x @ w1 + b1, 0.0)
    return jax.nn.sigmoid(h @ w2 + b2)


if __name__ == "__main__":
    # Small shapes consistent with the module: flattened image of 64 pixels,
    # hidden_dim=32, output_dim=1, batch=2.
    batch, image_size, hidden_dim, output_dim = 2, 64, 32, 1

    key = jax.random.PRNGKey(0)
    kx, kw1, kb1, kw2, kb2 = jax.random.split(key, 5)

    x = jax.random.normal(kx, (batch, image_size), dtype=jnp.float32)
    lim1 = 1.0 / (image_size ** 0.5)
    lim2 = 1.0 / (hidden_dim ** 0.5)
    w1 = jax.random.uniform(kw1, (image_size, hidden_dim), jnp.float32, -lim1, lim1)
    b1 = jax.random.uniform(kb1, (hidden_dim,), jnp.float32, -lim1, lim1)
    w2 = jax.random.uniform(kw2, (hidden_dim, output_dim), jnp.float32, -lim2, lim2)
    b2 = jax.random.uniform(kb2, (output_dim,), jnp.float32, -lim2, lim2)

    discriminator = make_discriminator(w1, b1, w2, b2)
    out = discriminator(x)
    jax.block_until_ready(out)

    ref = _reference_forward(x, w1, b1, w2, b2)
    assert out.shape == (batch, output_dim)
    # Tolerance loosened vs pure-f32 because matmul operands are bf16 on the MXU
    # (f32 accumulation); this is the expected numerical change, not a bug.
    assert jnp.allclose(out, ref, atol=2e-2, rtol=2e-2), "mismatch vs reference"

    print("KERNEL_OK")
</pallas_src>

<mosaic_0001>
module attributes {stable_mosaic.version = 11 : i64} {
  func.func @_discriminator_kernel(%arg0: i32, %arg1: memref<16x128xbf16, #tpu.memory_space<vmem>>, %arg2: memref<128x128xbf16, #tpu.memory_space<vmem>>, %arg3: memref<1x128xf32, #tpu.memory_space<vmem>>, %arg4: memref<128x128xbf16, #tpu.memory_space<vmem>>, %arg5: memref<1x128xf32, #tpu.memory_space<vmem>>, %arg6: memref<16x128xf32, #tpu.memory_space<vmem>>) attributes {dimension_semantics = [#tpu.dimension_semantics<parallel>], iteration_bounds = array<i64: 1>, scalar_prefetch = 0 : i64, scratch_operands = 0 : i64, tpu.core_type = #tpu.core_type<tc>, window_params = [{transform_indices = @transform_0, window_bounds = array<i64: 16, 128>}, {pipeline_mode = #tpu.pipeline_mode<synchronous>, transform_indices = @transform_1, window_bounds = array<i64: 128, 128>}, {pipeline_mode = #tpu.pipeline_mode<synchronous>, transform_indices = @transform_2, window_bounds = array<i64: 1, 128>}, {pipeline_mode = #tpu.pipeline_mode<synchronous>, transform_indices = @transform_3, window_bounds = array<i64: 128, 128>}, {pipeline_mode = #tpu.pipeline_mode<synchronous>, transform_indices = @transform_4, window_bounds = array<i64: 1, 128>}, {transform_indices = @transform_5, window_bounds = array<i64: 16, 128>}]} {
    %c0 = arith.constant 0 : index
    %c0_0 = arith.constant 0 : index
    %0 = vector.load %arg1[%c0, %c0_0] : memref<16x128xbf16, #tpu.memory_space<vmem>>, vector<16x128xbf16>
    %c0_1 = arith.constant 0 : index
    %c0_2 = arith.constant 0 : index
    %1 = vector.load %arg2[%c0_1, %c0_2] : memref<128x128xbf16, #tpu.memory_space<vmem>>, vector<128x128xbf16>
    %cst = arith.constant dense<0.000000e+00> : vector<16x128xf32>
    %2 = tpu.matmul %0, %1, %cst {dimension_numbers = #tpu.dot_dimension_numbers<[1], [0], [0], [1], [0, 0, 1, 1], [], []>} : vector<16x128xbf16>, vector<128x128xbf16>, vector<16x128xf32> -> vector<16x128xf32>
    %c0_3 = arith.constant 0 : index
    %c0_4 = arith.constant 0 : index
    %3 = vector.load %arg3[%c0_3, %c0_4] : memref<1x128xf32, #tpu.memory_space<vmem>>, vector<1x128xf32>
    %4 = vector.broadcast %3 : vector<1x128xf32> to vector<16x128xf32>
    %5 = arith.addf %2, %4 : vector<16x128xf32>
    %cst_5 = arith.constant 0.000000e+00 : f32
    %6 = vector.broadcast %cst_5 : f32 to vector<16x128xf32>
    %7 = arith.maximumf %5, %6 : vector<16x128xf32>
    %8 = arith.truncf %7 : vector<16x128xf32> to vector<16x128xbf16>
    %c0_6 = arith.constant 0 : index
    %c0_7 = arith.constant 0 : index
    %9 = vector.load %arg4[%c0_6, %c0_7] : memref<128x128xbf16, #tpu.memory_space<vmem>>, vector<128x128xbf16>
    %cst_8 = arith.constant dense<0.000000e+00> : vector<16x128xf32>
    %10 = tpu.matmul %8, %9, %cst_8 {dimension_numbers = #tpu.dot_dimension_numbers<[1], [0], [0], [1], [0, 0, 1, 1], [], []>} : vector<16x128xbf16>, vector<128x128xbf16>, vector<16x128xf32> -> vector<16x128xf32>
    %c0_9 = arith.constant 0 : index
    %c0_10 = arith.constant 0 : index
    %11 = vector.load %arg5[%c0_9, %c0_10] : memref<1x128xf32, #tpu.memory_space<vmem>>, vector<1x128xf32>
    %12 = vector.broadcast %11 : vector<1x128xf32> to vector<16x128xf32>
    %13 = arith.addf %10, %12 : vector<16x128xf32>
    %14 = arith.negf %13 : vector<16x128xf32>
    %15 = math.exp %14 : vector<16x128xf32>
    %cst_11 = arith.constant 1.000000e+00 : f32
    %16 = vector.broadcast %cst_11 : f32 to vector<16x128xf32>
    %17 = arith.addf %16, %15 : vector<16x128xf32>
    %18 = arith.divf %16, %17 : vector<16x128xf32>
    %c0_12 = arith.constant 0 : index
    %c0_13 = arith.constant 0 : index
    %19 = vector.load %arg6[%c0_12, %c0_13] : memref<16x128xf32, #tpu.memory_space<vmem>>, vector<16x128xf32>
    tpu.vector_store %arg6[%c0_12, %c0_13], %18 {strides = array<i32>} : memref<16x128xf32, #tpu.memory_space<vmem>>, vector<16x128xf32>,
    return
  }
  func.func @transform_0(%arg0: i32) -> (i32, i32) {
    %c0_i32 = arith.constant 0 : i32
    %c0_i32_0 = arith.constant 0 : i32
    return %arg0, %c0_i32 : i32, i32
  }
  func.func @transform_1(%arg0: i32) -> (i32, i32) {
    %c0_i32 = arith.constant 0 : i32
    %c0_i32_0 = arith.constant 0 : i32
    %c0_i32_1 = arith.constant 0 : i32
    return %c0_i32, %c0_i32_0 : i32, i32
  }
  func.func @transform_2(%arg0: i32) -> (i32, i32) {
    %c0_i32 = arith.constant 0 : i32
    %c0_i32_0 = arith.constant 0 : i32
    %c0_i32_1 = arith.constant 0 : i32
    return %c0_i32, %c0_i32_0 : i32, i32
  }
  func.func @transform_3(%arg0: i32) -> (i32, i32) {
    %c0_i32 = arith.constant 0 : i32
    %c0_i32_0 = arith.constant 0 : i32
    %c0_i32_1 = arith.constant 0 : i32
    return %c0_i32, %c0_i32_0 : i32, i32
  }
  func.func @transform_4(%arg0: i32) -> (i32, i32) {
    %c0_i32 = arith.constant 0 : i32
    %c0_i32_0 = arith.constant 0 : i32
    %c0_i32_1 = arith.constant 0 : i32
    return %c0_i32, %c0_i32_0 : i32, i32
  }
  func.func @transform_5(%arg0: i32) -> (i32, i32) {
    %c0_i32 = arith.constant 0 : i32
    %c0_i32_0 = arith.constant 0 : i32
    return %arg0, %c0_i32 : i32, i32
  }
}

</mosaic_0001>

<bundles_post_ra>
// kernel: _forward.1
= control target key start
LH: loop header
LB: loop body
LE: loop exit
PB: predicated region body
PF: predicated region fallthrough
CT: control target
= control target key end

     0   :  { %10 = vsyncpa [#allocation3], 0  ;;  %s537_s0 = inlined_call_operand.vmem [shape: bf16[16,128], index: 0, kind: input, shape index: {}]   ;;  %s538_s1 = inlined_call_operand.hbm [shape: bf16[128,128], index: 1, kind: input, shape index: {}]   ;;  %s539_s2 = inlined_call_operand.vmem [shape: f32[1,128], index: 2, kind: input, shape index: {}]   ;;  %s540_s3 = inlined_call_operand.hbm [shape: bf16[128,128], index: 3, kind: input, shape index: {}]   ;;  %s541_s4 = inlined_call_operand.vmem [shape: f32[1,128], index: 4, kind: input, shape index: {}]   ;;  %s542_s5 = inlined_call_operand.vmem [shape: f32[16,128], index: 5, kind: output, shape index: {}]  }
   0x1   :  { %11 = vsyncpa [#allocation5], 0  ;;  %s462_s18 = smov [#allocation2]   ;;  %s414_s22 = scalar_lea.hbm %s538_s1, 1024 }
   0x2   :  { %s19_s19 = sshll.u32 %s462_s18, 4  ;;  %p415_p0 = scmp.ne.s32.totalorder %s538_s1, %s414_s22  ;;  %s20_s19 = int_to_ptr.vmem [resolvable:$true] %s19_s19 }
   0x3   :  { %p418_p1 = scmp.lt.u32.totalorder %s414_s22, %s538_s1 }
   0x5   :  { %p420_p2 = pnand %p418_p1, %p415_p0 }
   0x7   :  { %423 = shalt.err (!%p420_p2)
}
   0x8   :  { %s424_s27 = scalar_lea.vmem %s20_s19, 1024  ;;  %p429_p4 = scmp.lt.s32.totalorder %s20_s19, %s20_s19 }
   0x9   :  { %p425_p3 = scmp.ne.s32.totalorder %s20_s19, %s424_s27  ;;  %p430_p5 = scmp.lt.s32.totalorder %s424_s27, %s424_s27 }
   0xb   :  { %p431_p6 = por %p430_p5, %p429_p4 }
   0xd   :  { %p432_p7 = pnand %p431_p6, %p425_p3 }
   0xf   :  { %435 = shalt.err (!%p432_p7)
}
  0x10   :  { %s463_s28 = smov 64   ;;  %s464_s29 = smov 4  }
  0x11   :  { %25 = dma.hbm_to_vmem [thread:$0]  %s538_s1, 1024, %s20_s19, [#allocation3], %s463_s28, %s463_s28, %s464_s29  }
  0x12   :  { %s465_s7 = smov [#allocation4]   ;;  %s436_s11 = scalar_lea.hbm %s540_s3, 1024 }
  0x13   :  { %s33_s8 = sshll.u32 %s465_s7, 4  ;;  %p437_p8 = scmp.ne.s32.totalorder %s540_s3, %s436_s11  ;;  %s34_s8 = int_to_ptr.vmem [resolvable:$true] %s33_s8 }
  0x14   :  { %p440_p9 = scmp.lt.u32.totalorder %s436_s11, %s540_s3 }
  0x16   :  { %p442_p10 = pnand %p440_p9, %p437_p8 }
  0x18   :  { %445 = shalt.err (!%p442_p10)
}
  0x19   :  { %s446_s16 = scalar_lea.vmem %s34_s8, 1024  ;;  %p451_p12 = scmp.lt.s32.totalorder %s34_s8, %s34_s8 }
  0x1a   :  { %p447_p11 = scmp.ne.s32.totalorder %s34_s8, %s446_s16  ;;  %p452_p13 = scmp.lt.s32.totalorder %s446_s16, %s446_s16 }
  0x1c   :  { %p453_p0 = por %p452_p13, %p451_p12 }
  0x1e   :  { %p454_p1 = pnand %p453_p0, %p447_p11 }
  0x20   :  { %457 = shalt.err (!%p454_p1)
}
  0x21   :  { %39 = dma.hbm_to_vmem [thread:$0]  %s540_s3, 1024, %s34_s8, [#allocation5], %s463_s28, %s463_s28, %s464_s29  }
  0x22   :  { %458 = dma.done.wait [#allocation3], 1024  }
  0x23   :  { %459 = vsyncadd [#allocation3], 4294966272 }
  0x24   :  { %460 = dma.done.wait [#allocation5], 1024  }
  0x25   :  { %461 = vsyncadd [#allocation5], 4294966272  ;;  %v466_v0 = vmov 0.0   ;;  %vm467_vm0 = vmmov 0   ;;  %v389_v1 = vld [vmem:[#allocation2] sm:$0xff]   ;;  %v390_v2 = vld [vmem:[#allocation2 + $0x8] sm:$0xff]  }
  0x26   :  { %343 = vmatprep.subr.bf16.mxu0 %v466_v0  ;;  %359 = vmatprep.mubr.msk.bf16.mxu0 %vm467_vm0, %v466_v0  ;;  %v391_v3 = vld [vmem:[#allocation2 + $0x10] sm:$0xff]   ;;  %v398_v4 = vld [vmem:[#allocation4] sm:$0xff]   ;;  %v392_v5 = vld [vmem:[#allocation2 + $0x18] sm:$0xff]  }
  0x27   :  { %363 = vmatprep.subr.bf16.mxu1 %v466_v0  ;;  %379 = vmatprep.mubr.msk.bf16.mxu1 %vm467_vm0, %v466_v0  ;;  %v399_v6 = vld [vmem:[#allocation4 + $0x8] sm:$0xff]   ;;  %v393_v7 = vld [vmem:[#allocation2 + $0x20] sm:$0xff]   ;;  %v400_v8 = vld [vmem:[#allocation4 + $0x10] sm:$0xff]  }
  0x28   :  { %344 = vmatpush3.bf16.msra.mxu0 %v389_v1  ;;  %364 = vmatpush3.bf16.msra.mxu1 %v398_v4  ;;  %v394_v9 = vld [vmem:[#allocation2 + $0x28] sm:$0xff]   ;;  %v401_v10 = vld [vmem:[#allocation4 + $0x18] sm:$0xff]   ;;  %v395_v11 = vld [vmem:[#allocation2 + $0x30] sm:$0xff]  }
  0x29   :  { %345 = vmatprep.subr.bf16.mxu0 %v466_v0  ;;  %365 = vmatprep.subr.bf16.mxu1 %v466_v0  ;;  %v402_v12 = vld [vmem:[#allocation4 + $0x20] sm:$0xff]   ;;  %v396_v13 = vld [vmem:[#allocation2 + $0x38] sm:$0xff]   ;;  %v403_v14 = vld [vmem:[#allocation4 + $0x28] sm:$0xff]  }
  0x2a   :  { %v397_v15 = vld [vmem:[%s537_s0] sm:$0xff]   ;;  %v404_v16 = vld [vmem:[#allocation4 + $0x30] sm:$0xff]   ;;  %v405_v17 = vld [vmem:[#allocation4 + $0x38] sm:$0xff]  }
  0x2b   :  { %v304_v18 = vld [vmem:[%s539_s2] ss:$0 sm:$0xff] }
  0x2c   :  { %346 = vmatpush3.bf16.msra.mxu0 %v390_v2  ;;  %366 = vmatpush3.bf16.msra.mxu1 %v399_v6  ;;  %v314_v28 = vld [vmem:[%s541_s4] ss:$0 sm:$0xff] }
  0x2d   :  { %347 = vmatprep.subr.bf16.mxu0 %v466_v0  ;;  %367 = vmatprep.subr.bf16.mxu1 %v466_v0 }
  0x30   :  { %348 = vmatpush3.bf16.msra.mxu0 %v391_v3  ;;  %368 = vmatpush3.bf16.msra.mxu1 %v400_v8 }
  0x31   :  { %349 = vmatprep.subr.bf16.mxu0 %v466_v0  ;;  %369 = vmatprep.subr.bf16.mxu1 %v466_v0 }
  0x34   :  { %350 = vmatpush3.bf16.msra.mxu0 %v392_v5  ;;  %370 = vmatpush3.bf16.msra.mxu1 %v401_v10 }
  0x35   :  { %351 = vmatprep.subr.bf16.mxu0 %v466_v0  ;;  %371 = vmatprep.subr.bf16.mxu1 %v466_v0 }
  0x38   :  { %352 = vmatpush3.bf16.msra.mxu0 %v393_v7  ;;  %372 = vmatpush3.bf16.msra.mxu1 %v402_v12 }
  0x39   :  { %353 = vmatprep.subr.bf16.mxu0 %v466_v0  ;;  %373 = vmatprep.subr.bf16.mxu1 %v466_v0 }
  0x3c   :  { %354 = vmatpush3.bf16.msra.mxu0 %v394_v9  ;;  %374 = vmatpush3.bf16.msra.mxu1 %v403_v14 }
  0x3d   :  { %355 = vmatprep.subr.bf16.mxu0 %v466_v0  ;;  %375 = vmatprep.subr.bf16.mxu1 %v466_v0 }
  0x40   :  { %356 = vmatpush3.bf16.msra.mxu0 %v395_v11  ;;  %376 = vmatpush3.bf16.msra.mxu1 %v404_v16 }
  0x41   :  { %357 = vmatprep.subr.bf16.mxu0 %v466_v0  ;;  %377 = vmatprep.subr.bf16.mxu1 %v466_v0 }
  0x44   :  { %358 = vmatpush3.bf16.msra.mxu0 %v396_v13  ;;  %378 = vmatpush3.bf16.msra.mxu1 %v405_v17 }
  0x47   :  { %360 = vmatmul.mubr.bf16.vlgmr.msra.gmra.mrb[0].mxu0 %v397_v15 }
 0x11a   :  { %v162_v19 = vpop.f32.mrb[0].mxu0 }
 0x11b   :  { %v163_v20 = vadd.f32 %v304_v18, %v162_v19  ;;  %v361_v21 = vpop.f32.mrb[1].mxu0 }
 0x11c   :  { %v165_v22 = vpop.f32.mrb[2].mxu0 }
 0x11d   :  { %v166_v23 = vadd.f32 %v304_v18, %v165_v22  ;;  %v362_v24 = vpop.f32.mrb[3].mxu0  ;;  %v169_v25 = vmax.f32 %v163_v20, 0.0 }
 0x11f   :  { %v170_v26 = vmax.f32 %v166_v23, 0.0 }
 0x121   :  { %v171_v27 = vpack.c.bf16 %v170_v26, %v169_v25 }
 0x123   :  { %380 = vmatmul.mubr.bf16.vlgmr.msra.gmra.mrb[0].mxu1 %v171_v27 }
 0x1f6   :  { %v277_v29 = vpop.f32.mrb[0].mxu1 }
 0x1f7   :  { %v278_v30 = vadd.f32 %v314_v28, %v277_v29  ;;  %v381_v31 = vpop.f32.mrb[1].mxu1 }
 0x1f8   :  { %v280_v32 = vpop.f32.mrb[2].mxu1 }
 0x1f9   :  { %v323_v33 = vmul.f32 -1.442695, %v278_v30  ;;  %v281_v34 = vadd.f32 %v314_v28, %v280_v32  ;;  %v382_v35 = vpop.f32.mrb[3].mxu1 }
 0x1fb   :  { %406 = vpow2.f32 %v323_v33  ;;  %v324_v36 = vmul.f32 -1.442695, %v281_v34 }
 0x1fd   :  { %408 = vpow2.f32 %v324_v36 }
 0x205   :  { %v407_v37 = vpop.eup %406 }
 0x206   :  { %v290_v38 = vadd.f32 1.0, %v407_v37 }
 0x207   :  { %v409_v39 = vpop.eup %408 }
 0x208   :  { %410 = vrcp.f32 %v290_v38  ;;  %v291_v40 = vadd.f32 1.0, %v409_v39 }
 0x20a   :  { %412 = vrcp.f32 %v291_v40 }
 0x212   :  { %v411_v41 = vpop.eup %410 }
 0x213   :  { %296 = vst [vmem:[%s542_s5] sm:$0xff] %v411_v41 }
 0x214   :  { %v413_v42 = vpop.eup %412 }
 0x215   :  { %297 = vst [vmem:[%s542_s5 + $0x8] sm:$0xff] %v413_v42 }
 0x216   :  { %302 = vsyncpa [#allocation3], 1 }
 0x217   :  { %303 = vsyncpa [#allocation5], 1 }

</bundles_post_ra>
